<compile_context>
chip_gen: v7x
topology: tpu7x:2x2x1
jax: 0.10.0
libtpu: 0.0.40
codegen_flags: <defaults>
</compile_context>

<pallas_src>
import functools

import jax
import jax.numpy as jnp
from jax.experimental import pallas as pl
from jax.experimental.pallas import tpu as pltpu


def _round_up(x, m):
    return -(-x // m) * m


def _textcnn_kernel(x_ref, w1_ref, b1_ref, w2_ref, b2_ref, out_ref, *,
                    seq_len, pool, kconv, fmap_pad, activation):
    """TextCNN forward for one batch tile.

    x_ref  : (BT, Lp, C)   bf16 input slab (batch-tile, padded time, word-dim)
    w1_ref : (C, K*Fp)     bf16 conv_1 weight, taps lane-padded+concatenated on the out axis
    b1_ref : (1, Fp)       f32 conv_1 bias (lane-padded)
    w2_ref : (K*Fp, Ep)    f32 conv_2 weight, taps stacked along the input axis (padded)
    b2_ref : (1, Ep)       f32 conv_2 bias (lane-padded)
    out_ref: (BT, Ep)      f32 output embeddings (lane-dense; cropped to E outside)
    """
    if activation == "tanh":
        act = jnp.tanh
    else:  # relu
        act = lambda v: jnp.maximum(v, 0.0)

    BT, Lp, C = x_ref.shape
    Fp = fmap_pad
    K = kconv
    L = seq_len
    L1 = L - K + 1                  # conv_1 output length
    L2 = -(-L1 // pool)             # ceil-mode pooled length
    L3 = L2 - K + 1                 # conv_2 output length (>= 1, checked in wrapper)

    # ---- conv_1: ONE bf16 MXU matmul covering all K taps ----
    x2d = x_ref[...].reshape(BT * Lp, C)                                   # bf16
    y = jnp.dot(x2d, w1_ref[...], preferred_element_type=jnp.float32)      # (BT*Lp, K*Fp) f32
    y3 = y.reshape(BT, Lp, K * Fp)

    # shifted tap accumulation: lane slices are 128-aligned, time shifts go to the XLU
    h = y3[:, :, :Fp]
    for j in range(1, K):
        tap = y3[:, :, j * Fp:(j + 1) * Fp]                                # (BT, Lp, Fp)
        h = h + pltpu.roll(tap, shift=Lp - j, axis=1)                      # rolled[t] = tap[t+j]
    h = h + b1_ref[...]                                # rows >= L1 hold junk but are never read

    # ---- ceil-mode max-pool + activation, fused with conv_2 column prefix sums ----
    need = {j + L3 - 1 for j in range(K)} | {j - 1 for j in range(1, K)}
    snap = {}
    running = None
    for i in range(L2):
        w = min(pool, L1 - i * pool)                   # partial last window (ceil_mode)
        win = h[:, i * pool:i * pool + w, :]           # (BT, w, Fp)
        pooled = act(jnp.max(win, axis=1))             # (BT, Fp)
        running = pooled if running is None else running + pooled
        if i in need:
            snap[i] = running

    # sums[j] = sum_{t < L3} pooled[j + t] = P[j+L3-1] - P[j-1]
    sums = []
    for j in range(K):
        s = snap[j + L3 - 1]
        if j > 0:
            s = s - snap[j - 1]
        sums.append(s)
    stacked = jnp.concatenate(sums, axis=-1)           # (BT, K*Fp), lane-tile aligned concat

    # ---- conv_2 fused with the time-mean: one f32 matmul per tile ----
    o = jnp.dot(stacked, w2_ref[...], preferred_element_type=jnp.float32)  # (BT, Ep)
    o = act(o * jnp.float32(1.0 / L3) + b2_ref[...])
    out_ref[...] = o


def textcnn_forward(x_blc, w1, b1, w2, b2, *, pool, activation,
                    block_b=256, min_grid_steps=2):
    """x_blc: (B, L, C) f32 input; w1/w2 in PyTorch Conv1d layout (out, in, k). Returns (B, E) f32."""
    B, L, C = x_blc.shape
    F, Cin, K = w1.shape
    E = w2.shape[0]
    if Cin != C:
        raise ValueError("conv_1 in-channels must match x")
    if L < K:
        raise ValueError("sequence length must be >= conv kernel size")
    L1 = L - K + 1
    L2 = -(-L1 // pool)
    L3 = L2 - K + 1
    if L3 < 1:
        raise ValueError("sequence too short: conv_2 output length would be <= 0")

    Fp = _round_up(F, 128)          # lane-pad each conv_1 tap
    Ep = _round_up(E, 128)          # lane-dense output store

    # host-side one-time weight re-layouts + pre-cast (no per-grid-step astype in the kernel):
    #   w1_cat[c, j*Fp + f] = w1[f, c, j]   -> (C, K*Fp)  bf16
    #   w2_flat[j*Fp + f, e] = w2[e, f, j]  -> (K*Fp, Ep) f32  (padded rows/cols are zero)
    w1_cat = jnp.pad(jnp.transpose(w1, (1, 2, 0)), ((0, 0), (0, 0), (0, Fp - F)))
    w1_cat = w1_cat.reshape(C, K * Fp).astype(jnp.bfloat16)
    w2_flat = jnp.pad(jnp.transpose(w2, (2, 1, 0)), ((0, 0), (0, Fp - F), (0, Ep - E)))
    w2_flat = w2_flat.reshape(K * Fp, Ep).astype(jnp.float32)
    b1_p = jnp.pad(b1, (0, Fp - F)).reshape(1, Fp).astype(jnp.float32)
    b2_p = jnp.pad(b2, (0, Ep - E)).reshape(1, Ep).astype(jnp.float32)

    # time-dim pad to a bf16 sublane multiple so reshape(BT*Lp, C) and downstream slabs align
    Lp = _round_up(L, 16)

    # batch tile from a VMEM budget (conservative: fits v7x's 64 MiB and a raised v5e limit)
    per_row = (4 * Lp * C               # double-buffered bf16 x block
               + 4 * Lp * K * Fp        # y (f32)
               + 4 * Lp * Fp            # h (f32)
               + 4 * (2 * K + 2) * Fp   # prefix / pooled slabs
               + 4 * K * Fp             # stacked
               + 8 * Ep)                # double-buffered f32 out block
    budget = 20 * 2 ** 20
    bt_fit = max(8, (budget // per_row) // 8 * 8)
    BT = min(block_b, int(bt_fit), _round_up(B, 8))
    if min_grid_steps > 1 and B > 8:
        # keep >= 2 grid steps when the batch allows (v7x has 2 TensorCores; cheap elsewhere)
        BT = min(BT, max(8, _round_up(-(-B // min_grid_steps), 8)))
    BT = max(8, BT)
    B_pad = _round_up(B, BT)

    weight_bytes = 2 * (C * K * Fp * 2 + K * Fp * Ep * 4 + (Fp + Ep) * 4)
    est_bytes = BT * per_row + weight_bytes
    vmem_limit = int(min(48 * 2 ** 20, max(32 * 2 ** 20, 2 * est_bytes)))

    # stream x as bf16 (dominant HBM traffic); pad batch and time dims
    x_pad = jnp.pad(x_blc, ((0, B_pad - B), (0, Lp - L), (0, 0))).astype(jnp.bfloat16)

    kernel = functools.partial(_textcnn_kernel, seq_len=L, pool=pool, kconv=K,
                               fmap_pad=Fp, activation=activation)

    out = pl.pallas_call(
        kernel,
        out_shape=jax.ShapeDtypeStruct((B_pad, Ep), jnp.float32),
        grid_spec=pltpu.PrefetchScalarGridSpec(
            num_scalar_prefetch=0,
            grid=(B_pad // BT,),
            in_specs=[
                pl.BlockSpec((BT, Lp, C), lambda b: (b, 0, 0)),    # batch tile of x (bf16)
                pl.BlockSpec((C, K * Fp), lambda b: (0, 0)),       # conv_1 weight (full, bf16)
                pl.BlockSpec((1, Fp), lambda b: (0, 0)),           # conv_1 bias
                pl.BlockSpec((K * Fp, Ep), lambda b: (0, 0)),      # conv_2 weight (full)
                pl.BlockSpec((1, Ep), lambda b: (0, 0)),           # conv_2 bias
            ],
            out_specs=pl.BlockSpec((BT, Ep), lambda b: (b, 0)),    # lane-dense (BT, Ep) store
        ),
        compiler_params=pltpu.CompilerParams(
            dimension_semantics=("parallel",),
            vmem_limit_bytes=vmem_limit),
    )(x_pad, w1_cat, b1_p, w2_flat, b2_p)

    return out[:B, :E]


# ---------------- pure-JAX f32 reference (mirrors the PyTorch module) ----------------
def _ref_forward(x_ncw, w1_ock, b1, w2_ock, b2, *, pool, activation):
    act = jnp.tanh if activation == "tanh" else (lambda v: jnp.maximum(v, 0.0))

    def conv1d(x, w, b):  # x: (B, Cin, L), w: (O, Cin, k), b: (O,)
        O, Ci, k = w.shape
        Lout = x.shape[-1] - k + 1
        out = jnp.broadcast_to(b[None, :, None], (x.shape[0], O, Lout)).astype(jnp.float32)
        for j in range(k):
            out = out + jnp.sum(
                x[:, None, :, j:j + Lout] * w[None, :, :, j, None], axis=2
            )
        return out

    h = conv1d(x_ncw, w1_ock, b1)                           # (B, F, L1)
    B, F, L1 = h.shape
    L2 = -(-L1 // pool)
    Lp = L2 * pool
    hp = jnp.pad(h, ((0, 0), (0, 0), (0, Lp - L1)), constant_values=-jnp.inf)
    pooled = jnp.max(hp.reshape(B, F, L2, pool), axis=-1)   # ceil_mode max-pool
    pooled = act(pooled)
    o = conv1d(pooled, w2_ock, b2)                          # (B, E, L3)
    o = jnp.mean(o, axis=2)                                 # (B, E)
    return act(o)


if __name__ == "__main__":
    # Module hyper-parameters (small, consistent with TextCNN.__init__)
    B = 2                 # batch
    DIM_WORD = 8          # conv_1 in-channels
    DIM_FMAP = 16         # conv_1 out / conv_2 in channels
    DIM_EMB = 16          # conv_2 out-channels (embedding dim)
    KCONV = 3             # kernel_size_conv
    KPOOL = 3             # kernel_size_max_pool (exercises the ceil-mode partial window)
    SEQ = 16              # sequence length
    ACT = "tanh"

    key = jax.random.PRNGKey(0)
    kx, kw1, kb1, kw2, kb2 = jax.random.split(key, 5)

    # deterministic synthetic parameters (PyTorch Conv1d weight layout: (out, in, k))
    x_ncw = jax.random.normal(kx, (B, DIM_WORD, SEQ), jnp.float32)
    w1 = jax.random.normal(kw1, (DIM_FMAP, DIM_WORD, KCONV), jnp.float32) * 0.2
    b1 = jax.random.normal(kb1, (DIM_FMAP,), jnp.float32) * 0.1
    w2 = jax.random.normal(kw2, (DIM_EMB, DIM_FMAP, KCONV), jnp.float32) * 0.2
    b2 = jax.random.normal(kb2, (DIM_EMB,), jnp.float32) * 0.1

    # kernel consumes x as (B, L, C): time on sublanes, channels on lanes
    x_blc = jnp.transpose(x_ncw, (0, 2, 1))

    out = textcnn_forward(x_blc, w1, b1, w2, b2, pool=KPOOL, activation=ACT)
    out = jax.block_until_ready(out)

    ref = _ref_forward(x_ncw, w1, b1, w2, b2, pool=KPOOL, activation=ACT)
    ref = jax.block_until_ready(ref)

    assert out.shape == (B, DIM_EMB)
    # x / conv_1 weights are streamed bf16 (perf review), so tolerance vs the f32 reference
    # is relaxed from 1e-3 to 5e-2; the all-f32 path of this kernel meets 1e-3.
    max_err = float(jnp.max(jnp.abs(out - ref)))
    assert max_err < 5e-2, f"mismatch vs reference: max abs err = {max_err}"

    print("KERNEL_OK")
</pallas_src>

<mosaic_0001>
module attributes {stable_mosaic.version = 11 : i64} {
  func.func @_textcnn_kernel(%arg0: i32, %arg1: memref<8x16x8xbf16, #tpu.memory_space<vmem>>, %arg2: memref<8x384xbf16, #tpu.memory_space<vmem>>, %arg3: memref<1x128xf32, #tpu.memory_space<vmem>>, %arg4: memref<384x128xf32, #tpu.memory_space<vmem>>, %arg5: memref<1x128xf32, #tpu.memory_space<vmem>>, %arg6: memref<8x128xf32, #tpu.memory_space<vmem>>) attributes {dimension_semantics = [#tpu.dimension_semantics<parallel>], iteration_bounds = array<i64: 1>, scalar_prefetch = 0 : i64, scratch_operands = 0 : i64, tpu.core_type = #tpu.core_type<tc>, window_params = [{transform_indices = @transform_0, window_bounds = array<i64: 8, 16, 8>}, {pipeline_mode = #tpu.pipeline_mode<synchronous>, transform_indices = @transform_1, window_bounds = array<i64: 8, 384>}, {pipeline_mode = #tpu.pipeline_mode<synchronous>, transform_indices = @transform_2, window_bounds = array<i64: 1, 128>}, {pipeline_mode = #tpu.pipeline_mode<synchronous>, transform_indices = @transform_3, window_bounds = array<i64: 384, 128>}, {pipeline_mode = #tpu.pipeline_mode<synchronous>, transform_indices = @transform_4, window_bounds = array<i64: 1, 128>}, {transform_indices = @transform_5, window_bounds = array<i64: 8, 128>}]} {
    %c0 = arith.constant 0 : index
    %c0_0 = arith.constant 0 : index
    %c0_1 = arith.constant 0 : index
    %0 = vector.load %arg1[%c0, %c0_0, %c0_1] : memref<8x16x8xbf16, #tpu.memory_space<vmem>>, vector<8x16x8xbf16>
    %1 = vector.shape_cast %0 : vector<8x16x8xbf16> to vector<128x8xbf16>
    %c0_2 = arith.constant 0 : index
    %c0_3 = arith.constant 0 : index
    %2 = vector.load %arg2[%c0_2, %c0_3] : memref<8x384xbf16, #tpu.memory_space<vmem>>, vector<8x384xbf16>
    %cst = arith.constant dense<0.000000e+00> : vector<128x384xf32>
    %3 = tpu.matmul %1, %2, %cst {dimension_numbers = #tpu.dot_dimension_numbers<[1], [0], [0], [1], [0, 0, 1, 1], [], []>} : vector<128x8xbf16>, vector<8x384xbf16>, vector<128x384xf32> -> vector<128x384xf32>
    %4 = vector.shape_cast %3 : vector<128x384xf32> to vector<8x16x384xf32>
    %5 = vector.extract_strided_slice %4 {offsets = [0, 0, 0], sizes = [8, 16, 128], strides = [1, 1, 1]} : vector<8x16x384xf32> to vector<8x16x128xf32>
    %6 = vector.extract_strided_slice %4 {offsets = [0, 0, 128], sizes = [8, 16, 128], strides = [1, 1, 1]} : vector<8x16x384xf32> to vector<8x16x128xf32>
    %c15_i32 = arith.constant 15 : i32
    %7 = tpu.dynamic_rotate %6 by %c15_i32 dim 1 : vector<8x16x128xf32>, i32 -> vector<8x16x128xf32>
    %8 = arith.addf %5, %7 : vector<8x16x128xf32>
    %9 = vector.extract_strided_slice %4 {offsets = [0, 0, 256], sizes = [8, 16, 128], strides = [1, 1, 1]} : vector<8x16x384xf32> to vector<8x16x128xf32>
    %c14_i32 = arith.constant 14 : i32
    %10 = tpu.dynamic_rotate %9 by %c14_i32 dim 1 : vector<8x16x128xf32>, i32 -> vector<8x16x128xf32>
    %11 = arith.addf %8, %10 : vector<8x16x128xf32>
    %c0_4 = arith.constant 0 : index
    %c0_5 = arith.constant 0 : index
    %12 = vector.load %arg3[%c0_4, %c0_5] : memref<1x128xf32, #tpu.memory_space<vmem>>, vector<1x128xf32>
    %13 = vector.shape_cast %12 : vector<1x128xf32> to vector<1x1x128xf32>
    %14 = vector.broadcast %13 : vector<1x1x128xf32> to vector<8x16x128xf32>
    %15 = arith.addf %11, %14 : vector<8x16x128xf32>
    %16 = vector.extract_strided_slice %15 {offsets = [0, 0, 0], sizes = [8, 3, 128], strides = [1, 1, 1]} : vector<8x16x128xf32> to vector<8x3x128xf32>
    %cst_6 = arith.constant dense<0xFF800000> : vector<8x128xf32>
    %17 = vector.multi_reduction <maximumf>, %16, %cst_6 [1] : vector<8x3x128xf32> to vector<8x128xf32>
    %18 = math.tanh %17 : vector<8x128xf32>
    %19 = vector.extract_strided_slice %15 {offsets = [0, 3, 0], sizes = [8, 3, 128], strides = [1, 1, 1]} : vector<8x16x128xf32> to vector<8x3x128xf32>
    %cst_7 = arith.constant dense<0xFF800000> : vector<8x128xf32>
    %20 = vector.multi_reduction <maximumf>, %19, %cst_7 [1] : vector<8x3x128xf32> to vector<8x128xf32>
    %21 = math.tanh %20 : vector<8x128xf32>
    %22 = arith.addf %18, %21 : vector<8x128xf32>
    %23 = vector.extract_strided_slice %15 {offsets = [0, 6, 0], sizes = [8, 3, 128], strides = [1, 1, 1]} : vector<8x16x128xf32> to vector<8x3x128xf32>
    %cst_8 = arith.constant dense<0xFF800000> : vector<8x128xf32>
    %24 = vector.multi_reduction <maximumf>, %23, %cst_8 [1] : vector<8x3x128xf32> to vector<8x128xf32>
    %25 = math.tanh %24 : vector<8x128xf32>
    %26 = arith.addf %22, %25 : vector<8x128xf32>
    %27 = vector.extract_strided_slice %15 {offsets = [0, 9, 0], sizes = [8, 3, 128], strides = [1, 1, 1]} : vector<8x16x128xf32> to vector<8x3x128xf32>
    %cst_9 = arith.constant dense<0xFF800000> : vector<8x128xf32>
    %28 = vector.multi_reduction <maximumf>, %27, %cst_9 [1] : vector<8x3x128xf32> to vector<8x128xf32>
    %29 = math.tanh %28 : vector<8x128xf32>
    %30 = arith.addf %26, %29 : vector<8x128xf32>
    %31 = vector.extract_strided_slice %15 {offsets = [0, 12, 0], sizes = [8, 2, 128], strides = [1, 1, 1]} : vector<8x16x128xf32> to vector<8x2x128xf32>
    %cst_10 = arith.constant dense<0xFF800000> : vector<8x128xf32>
    %32 = vector.multi_reduction <maximumf>, %31, %cst_10 [1] : vector<8x2x128xf32> to vector<8x128xf32>
    %33 = math.tanh %32 : vector<8x128xf32>
    %34 = arith.addf %30, %33 : vector<8x128xf32>
    %35 = arith.subf %30, %18 : vector<8x128xf32>
    %36 = arith.subf %34, %22 : vector<8x128xf32>
    %37 = tpu.concatenate %26, %35, %36 in 1 : vector<8x128xf32>, vector<8x128xf32>, vector<8x128xf32> -> vector<8x384xf32>
    %c0_11 = arith.constant 0 : index
    %c0_12 = arith.constant 0 : index
    %38 = vector.load %arg4[%c0_11, %c0_12] : memref<384x128xf32, #tpu.memory_space<vmem>>, vector<384x128xf32>
    %cst_13 = arith.constant dense<0.000000e+00> : vector<8x128xf32>
    %39 = tpu.matmul %37, %38, %cst_13 {dimension_numbers = #tpu.dot_dimension_numbers<[1], [0], [0], [1], [0, 0, 1, 1], [], []>} : vector<8x384xf32>, vector<384x128xf32>, vector<8x128xf32> -> vector<8x128xf32>
    %cst_14 = arith.constant 0.333333343 : f32
    %40 = vector.broadcast %cst_14 : f32 to vector<8x128xf32>
    %41 = arith.mulf %39, %40 : vector<8x128xf32>
    %c0_15 = arith.constant 0 : index
    %c0_16 = arith.constant 0 : index
    %42 = vector.load %arg5[%c0_15, %c0_16] : memref<1x128xf32, #tpu.memory_space<vmem>>, vector<1x128xf32>
    %43 = vector.broadcast %42 : vector<1x128xf32> to vector<8x128xf32>
    %44 = arith.addf %41, %43 : vector<8x128xf32>
    %45 = math.tanh %44 : vector<8x128xf32>
    %c0_17 = arith.constant 0 : index
    %c0_18 = arith.constant 0 : index
    %46 = vector.load %arg6[%c0_17, %c0_18] : memref<8x128xf32, #tpu.memory_space<vmem>>, vector<8x128xf32>
    tpu.vector_store %arg6[%c0_17, %c0_18], %45 {strides = array<i32>} : memref<8x128xf32, #tpu.memory_space<vmem>>, vector<8x128xf32>,
    return
  }
  func.func @transform_0(%arg0: i32) -> (i32, i32, i32) {
    %c0_i32 = arith.constant 0 : i32
    %c0_i32_0 = arith.constant 0 : i32
    %c0_i32_1 = arith.constant 0 : i32
    return %arg0, %c0_i32, %c0_i32_0 : i32, i32, i32
  }
  func.func @transform_1(%arg0: i32) -> (i32, i32) {
    %c0_i32 = arith.constant 0 : i32
    %c0_i32_0 = arith.constant 0 : i32
    %c0_i32_1 = arith.constant 0 : i32
    return %c0_i32, %c0_i32_0 : i32, i32
  }
  func.func @transform_2(%arg0: i32) -> (i32, i32) {
    %c0_i32 = arith.constant 0 : i32
    %c0_i32_0 = arith.constant 0 : i32
    %c0_i32_1 = arith.constant 0 : i32
    return %c0_i32, %c0_i32_0 : i32, i32
  }
  func.func @transform_3(%arg0: i32) -> (i32, i32) {
    %c0_i32 = arith.constant 0 : i32
    %c0_i32_0 = arith.constant 0 : i32
    %c0_i32_1 = arith.constant 0 : i32
    return %c0_i32, %c0_i32_0 : i32, i32
  }
  func.func @transform_4(%arg0: i32) -> (i32, i32) {
    %c0_i32 = arith.constant 0 : i32
    %c0_i32_0 = arith.constant 0 : i32
    %c0_i32_1 = arith.constant 0 : i32
    return %c0_i32, %c0_i32_0 : i32, i32
  }
  func.func @transform_5(%arg0: i32) -> (i32, i32) {
    %c0_i32 = arith.constant 0 : i32
    %c0_i32_0 = arith.constant 0 : i32
    return %arg0, %c0_i32 : i32, i32
  }
}

</mosaic_0001>

<bundles_post_ra>
// kernel: tpu_custom_call.1
= control target key start
LH: loop header
LB: loop body
LE: loop exit
PB: predicated region body
PF: predicated region fallthrough
CT: control target
= control target key end

     0   :  { %10 = vsyncpa [#allocation3], 0  ;;  %s2039_s0 = inlined_call_operand.vmem [shape: bf16[8,16,8], index: 0, kind: input, shape index: {}]   ;;  %s2040_s1 = inlined_call_operand.vmem [shape: bf16[8,384], index: 1, kind: input, shape index: {}]   ;;  %s2041_s2 = inlined_call_operand.vmem [shape: f32[1,128], index: 2, kind: input, shape index: {}]   ;;  %s2042_s3 = inlined_call_operand.hbm [shape: f32[384,128], index: 3, kind: input, shape index: {}]   ;;  %s2043_s4 = inlined_call_operand.vmem [shape: f32[1,128], index: 4, kind: input, shape index: {}]   ;;  %s2044_s5 = inlined_call_operand.hbm [shape: f32[8,128], index: 5, kind: output, shape index: {}]  }
   0x1   :  { %11 = vsyncpa [#allocation4], 0  ;;  %s1481_s18 = smov [#allocation2]   ;;  %s1433_s22 = scalar_lea.hbm %s2042_s3, 6144 }
   0x2   :  { %s23_s19 = sshll.u32 %s1481_s18, 4  ;;  %p1434_p0 = scmp.ne.s32.totalorder %s2042_s3, %s1433_s22  ;;  %s24_s19 = int_to_ptr.vmem [resolvable:$true] %s23_s19 }
   0x3   :  { %p1437_p1 = scmp.lt.u32.totalorder %s1433_s22, %s2042_s3 }
   0x5   :  { %p1439_p2 = pnand %p1437_p1, %p1434_p0 }
   0x7   :  { %1442 = shalt.err (!%p1439_p2)
}
   0x8   :  { %s1443_s27 = scalar_lea.vmem %s24_s19, 6144  ;;  %p1448_p4 = scmp.lt.s32.totalorder %s24_s19, %s24_s19 }
   0x9   :  { %p1444_p3 = scmp.ne.s32.totalorder %s24_s19, %s1443_s27  ;;  %p1449_p5 = scmp.lt.s32.totalorder %s1443_s27, %s1443_s27 }
   0xb   :  { %p1450_p6 = por %p1449_p5, %p1448_p4 }
   0xd   :  { %p1451_p7 = pnand %p1450_p6, %p1444_p3 }
   0xf   :  { %1454 = shalt.err (!%p1451_p7)
}
  0x10   :  { %s1482_s28 = smov 128   ;;  %s1483_s29 = smov 8  }
  0x11   :  { %29 = dma.hbm_to_vmem [thread:$0]  %s2042_s3, 6144, %s24_s19, [#allocation3], %s1482_s28, %s1482_s28, %s1483_s29  }
  0x12   :  { %1477 = dma.done.wait [#allocation3], 6144  }
  0x13   :  { %1478 = vsyncadd [#allocation3], 4294961152  ;;  %v1484_v0 = vmov 0   ;;  %v52_v1 = vld [vmem:[%s2040_s1] sm:$0xff]  ;;  %vm127_vm0 = vcmask 1043456   ;;  %v1343_v7 = vld [vmem:[%s2039_s0 + $0x30] sm:$0xff]   ;;  %v363_v15 = vlaneseq }
  0x14   :  { %169 = vmatprep.mubr.bf16.mxu0 %v1484_v0  ;;  %229 = vmatprep.mubr.bf16.mxu1 %v1484_v0  ;;  %v1138_v2 = vcombine.high %v52_v1, %v52_v1  ;;  %v1137_v3 = vcombine.low %v52_v1, %v52_v1  ;;  %v1342_v4 = vld [vmem:[%s2039_s0] sm:$0xff]   ;;  %v1344_v5 = vld [vmem:[%s2040_s1 + $0x8] ss:$0 sps:$4 sm:$0xff]   ;;  %vm102_vm1 = vcmask 64512   ;;  %v1346_v10 = vld [vmem:[%s2039_s0 + $0x38] sm:$0xff]   ;;  %v1485_v26 = vmov 0.0|0.0  }
  0x15   :  { %v135_v8 = vsel %vm127_vm0, %v1344_v5, 0  ;;  %v1345_v9 = vld [vmem:[%s2039_s0 + $0x8] sm:$0xff]   ;;  %v1347_v11 = vld [vmem:[%s2039_s0 + $0x10] sm:$0xff]   ;;  %v1348_v12 = vld [vmem:[%s2039_s0 + $0x18] sm:$0xff]   ;;  %v1577_v25 = vshrl.u32 %v363_v15, 7  ;;  %vm470_vm4 = vcmask 1042432  }
  0x16   :  { %1140 = vmatprep.subr.msk.bf16.mxu0 %vm127_vm0, %v1138_v2  ;;  %1329 = vmatprep.subr.msk.bf16.mxu1 %vm127_vm0, %v1138_v2  ;;  %v129_v6 = vsel %vm127_vm0, %v1137_v3, 0  ;;  %v1349_v13 = vld [vmem:[%s2039_s0 + $0x20] sm:$0xff]   ;;  %v1350_v14 = vld [vmem:[%s2039_s0 + $0x28] sm:$0xff]   ;;  %v933_v27 = vld [vmem:[#allocation2 + $0x90] sm:$0xff]  ;;  %vm535_vm5 = vcmask 1045507   ;;  %vm608_vm6 = vcmask 1047558  }
  0x17   :  { %138 = vmatpush1.bf16.msra.mxu0 %v129_v6  ;;  %1330 = vmatpush1.bf16.msra.mxu1 %v129_v6  ;;  %v931_v16 = vld [vmem:[#allocation2 + $0x80] sm:$0xff]  ;;  %v932_v17 = vld [vmem:[#allocation2 + $0x88] sm:$0xff]  ;;  %v934_v28 = vld [vmem:[#allocation2 + $0x98] sm:$0xff]  ;;  %vm365_vm2 = vcmp.lt.s32.totalorder %v1577_v25, 7  ;;  %vm414_vm3 = vcmp.lt.s32.totalorder %v1577_v25, 6  ;;  %vm610_vm7 = vcmask 1040384  }
  0x18   :  { %1331 = vmatprep.subr.msk.bf16.mxu1 %vm127_vm0, %v1344_v5  ;;  %v1273_v18 = vpack.c.bf16 %v932_v17, %v931_v16  ;;  %v915_v19 = vld [vmem:[#allocation2] sm:$0xff]  ;;  %v916_v20 = vld [vmem:[#allocation2 + $0x8] sm:$0xff]  ;;  %1305 = vmatprep.subr.bf16.mxu0 %v1485_v26  ;;  %v1277_v31 = vpack.c.bf16 %v934_v28, %v933_v27  ;;  %v917_v32 = vld [vmem:[#allocation2 + $0x10] sm:$0xff]  ;;  %vm698_vm8 = vcmask 1043457   ;;  %vm771_vm9 = vcmask 1045508   ;;  %s1488_s27 = smov [#allocation5]  }
  0x19   :  { %v947_v21 = vld [vmem:[#allocation2 + $0x100] sm:$0xff]  ;;  %v948_v22 = vld [vmem:[#allocation2 + $0x108] sm:$0xff]  ;;  %v1275_v23 = vpack.c.bf16 %v916_v20, %v915_v19  ;;  %v918_v33 = vld [vmem:[#allocation2 + $0x18] sm:$0xff]  ;;  %vm1486_vm10 = vmmov 0   ;;  %vm868_vm11 = vcmask 1041409   ;;  %vm870_vm12 = vcmask 1042434  }
  0x1a   :  { %1141 = vmatmul.mubr.msk.bf16.vlgmr.msra.gmra.mrb[0].mxu0 %vm102_vm1, %v1342_v4  ;;  %1147 = vmatmul.mubr.msk.bf16.vlgmr.msra.gmra.mrb[0].mxu1 %vm102_vm1, %v1343_v7  ;;  %v1306_v24 = vpack.c.bf16 %v948_v22, %v947_v21  ;;  %v949_v36 = vld [vmem:[#allocation2 + $0x110] sm:$0xff]  ;;  %v950_v37 = vld [vmem:[#allocation2 + $0x118] sm:$0xff]  ;;  %v1279_v38 = vpack.c.bf16 %v918_v33, %v917_v32  ;;  %v935_v45 = vld [vmem:[#allocation2 + $0xa0] sm:$0xff]  ;;  %vm872_vm13 = vcmask 1043459   ;;  %vm874_vm14 = vcmask 1044484   ;;  %s1120_s28 = sshll.u32 %s1488_s27, 4  ;;  %s1121_s28 = int_to_ptr.vmem [resolvable:$true] %s1120_s28 }
  0x1b   :  { %1221 = vmatpush3.bf16.msra.mxu1 %v135_v8  ;;  %179 = vmatprep.mubr.bf16.mxu0 %v1484_v0  ;;  %v1309_v42 = vpack.c.bf16 %v950_v37, %v949_v36  ;;  %v936_v46 = vld [vmem:[#allocation2 + $0xa8] sm:$0xff]  ;;  %v919_v51 = vld [vmem:[#allocation2 + $0x20] sm:$0xff]  ;;  %v937_v60 = vld [vmem:[#allocation2 + $0xb0] sm:$0xff]  ;;  %vm876_vm15 = vcmask 1045509   ;;  %vm878_vm0 = vcmask 1046534   ;;  %s1455_s29 = scalar_lea.vmem %s1121_s28, 128  ;;  %p1460_p9 = scmp.lt.s32.totalorder %s1121_s28, %s1121_s28 }
  0x1c   :  { %239 = vmatprep.mubr.bf16.mxu1 %v1484_v0  ;;  %1274 = vmatprep.subr.bf16.mxu1 %v1273_v18  ;;  %v1281_v50 = vpack.c.bf16 %v936_v46, %v935_v45  ;;  %v920_v52 = vld [vmem:[#allocation2 + $0x28] sm:$0xff]  ;;  %v951_v53 = vld [vmem:[#allocation2 + $0x120] sm:$0xff]  ;;  %v938_v61 = vld [vmem:[#allocation2 + $0xb8] sm:$0xff]  ;;  %p1456_p8 = scmp.ne.s32.totalorder %s1121_s28, %s1455_s29  ;;  %p1461_p10 = scmp.lt.s32.totalorder %s1455_s29, %s1455_s29 }
  0x1d   :  { %1307 = vmatpush3.bf16.msra.mxu0 %v1306_v24  ;;  %v952_v54 = vld [vmem:[#allocation2 + $0x128] sm:$0xff]  ;;  %v1283_v55 = vpack.c.bf16 %v920_v52, %v919_v51  ;;  %v953_v2 = vld [vmem:[#allocation2 + $0x130] sm:$0xff]  ;;  %v954_v3 = vld [vmem:[#allocation2 + $0x138] sm:$0xff]  ;;  %v1285_v8 = vpack.c.bf16 %v938_v61, %v937_v60 }
  0x1e   :  { %1308 = vmatprep.subr.bf16.mxu0 %v1485_v26  ;;  %v923_v16 = vld [vmem:[#allocation2 + $0x40] sm:$0xff]  ;;  %v924_v17 = vld [vmem:[#allocation2 + $0x48] sm:$0xff]  ;;  %v1315_v21 = vpack.c.bf16 %v954_v3, %v953_v2  ;;  %v941_v24 = vld [vmem:[#allocation2 + $0xd0] sm:$0xff]  ;;  %p1462_p11 = por %p1461_p10, %p1460_p9 }
  0x1f   :  { %v955_v22 = vld [vmem:[#allocation2 + $0x140] sm:$0xff]  ;;  %v1291_v33 = vpack.c.bf16 %v924_v17, %v923_v16  ;;  %v925_v36 = vld [vmem:[#allocation2 + $0x50] sm:$0xff]  ;;  %v926_v37 = vld [vmem:[#allocation2 + $0x58] sm:$0xff] }
  0x20   :  { %v1295_v52 = vpack.c.bf16 %v926_v37, %v925_v36  ;;  %v928_v60 = vld [vmem:[#allocation2 + $0x68] sm:$0xff]  ;;  %v945_v61 = vld [vmem:[#allocation2 + $0xf0] sm:$0xff]  ;;  %p1463_p12 = pnand %p1462_p11, %p1456_p8 }
  0x21   :  { %1310 = vmatpush3.bf16.msra.mxu0 %v1309_v42  ;;  %v943_v42 = vld [vmem:[#allocation2 + $0xe0] sm:$0xff] }
  0x22   :  { %1142 = vmatmul.mubr.msk.bf16.gmra.mrb[4].mxu0 %vm102_vm1, %v1345_v9  ;;  %1148 = vmatmul.mubr.msk.bf16.gmra.mrb[4].mxu1 %vm102_vm1, %v1346_v10 }
  0x23   :  { %189 = vmatprep.mubr.bf16.mxu0 %v1484_v0  ;;  %1222 = vmatprep.mubr.msk.bf16.mxu1 %vm102_vm1, %v1342_v4  ;;  %v921_v4 = vld [vmem:[#allocation2 + $0x30] sm:$0xff] }
  0x24   :  { %1311 = vmatprep.subr.bf16.mxu0 %v1485_v26 }
  0x2a   :  { %1143 = vmatmul.mubr.msk.bf16.gmra.mrb[8].mxu0 %vm102_vm1, %v1347_v11  ;;  %1223 = vmatmul.mubr.msk.bf16.vlgmr.msra.gmra.mrb[8].mxu1 %vm102_vm1, %v1345_v9  ;;  %v922_v9 = vld [vmem:[#allocation2 + $0x38] sm:$0xff] }
  0x2b   :  { %199 = vmatprep.mubr.bf16.mxu0 %v1484_v0  ;;  %1226 = vmatprep.mubr.msk.bf16.mxu1 %vm102_vm1, %v1347_v11  ;;  %v940_v11 = vld [vmem:[#allocation2 + $0xc8] sm:$0xff] }
  0x2c   :  { %1276 = vmatpush3.bf16.msra.mxu1 %v1275_v23  ;;  %v956_v23 = vld [vmem:[#allocation2 + $0x148] sm:$0xff] }
  0x2d   :  { %1278 = vmatprep.subr.bf16.mxu1 %v1277_v31 }
  0x30   :  { %1280 = vmatpush3.bf16.msra.mxu1 %v1279_v38 }
  0x31   :  { %1282 = vmatprep.subr.bf16.mxu1 %v1281_v50 }
  0x32   :  { %1144 = vmatmul.mubr.msk.bf16.gmra.mrb[12].mxu0 %vm102_vm1, %v1348_v12  ;;  %1227 = vmatmul.mubr.msk.bf16.gmra.mrb[12].mxu1 %vm102_vm1, %v1348_v12 }
  0x33   :  { %209 = vmatprep.mubr.bf16.mxu0 %v1484_v0  ;;  %1230 = vmatprep.mubr.msk.bf16.mxu1 %vm102_vm1, %v1349_v13 }
  0x34   :  { %1284 = vmatpush3.bf16.msra.mxu1 %v1283_v55 }
  0x35   :  { %1286 = vmatprep.subr.bf16.mxu1 %v1285_v8 }
  0x3a   :  { %1145 = vmatmul.mubr.msk.bf16.gmra.mrb[16].mxu0 %vm102_vm1, %v1349_v13  ;;  %1231 = vmatmul.mubr.msk.bf16.gmra.mrb[16].mxu1 %vm102_vm1, %v1350_v14 }
  0x3b   :  { %219 = vmatprep.mubr.bf16.mxu0 %v1484_v0  ;;  %1234 = vmatprep.mubr.msk.bf16.mxu1 %vm102_vm1, %v1343_v7  ;;  %v1312_v7 = vpack.c.bf16 %v952_v54, %v951_v53  ;;  %v1614_v53 = vld [vmem:[#allocation2 + $0x160] sm:$0xff]  ;;  %v1616_v54 = vld [vmem:[#allocation2 + $0x168] sm:$0xff] }
  0x3d   :  { %1313 = vmatpush3.bf16.msra.mxu0 %v1312_v7  ;;  %v1620_v7 = vld [vmem:[#allocation2 + $0x78] sm:$0xff] }
  0x3e   :  { %1314 = vmatprep.subr.bf16.mxu0 %v1485_v26 }
  0x41   :  { %1316 = vmatpush3.bf16.msra.mxu0 %v1315_v21 }
  0x42   :  { %1146 = vmatmul.mubr.msk.bf16.gmra.mrb[20].mxu0 %vm102_vm1, %v1350_v14  ;;  %1235 = vmatmul.mubr.msk.bf16.gmra.mrb[20].mxu1 %vm102_vm1, %v1346_v10  ;;  %v939_v10 = vld [vmem:[#allocation2 + $0xc0] sm:$0xff]  ;;  %v1287_v14 = vpack.c.bf16 %v922_v9, %v921_v4  ;;  %vm880_vm1 = vcmask 1047559  }
  0x43   :  { %v1289_v15 = vpack.c.bf16 %v940_v11, %v939_v10  ;;  %1317 = vmatprep.subr.bf16.mxu0 %v1485_v26 }
  0x44   :  { %1288 = vmatpush3.bf16.msra.mxu1 %v1287_v14 }
  0x45   :  { %1290 = vmatprep.subr.bf16.mxu1 %v1289_v15 }
  0x48   :  { %1292 = vmatpush3.bf16.msra.mxu1 %v1291_v33 }
  0xed   :  { %v171_v29 = vpop.f32.mrb[0].mxu0  ;;  %v231_v30 = vpop.f32.mrb[0].mxu1 }
  0xee   :  { %v173_v34 = vpop.f32.mrb[1].mxu0  ;;  %v233_v35 = vpop.f32.mrb[1].mxu1 }
  0xef   :  { %v353_v39 = vrot.slane %v233_v35, 1  ;;  %v175_v40 = vpop.f32.mrb[2].mxu0  ;;  %v235_v41 = vpop.f32.mrb[2].mxu1  ;;  %v347_v47 = vrot.slane %v173_v34, 1  ;;  %v1318_v34 = vpack.c.bf16 %v956_v23, %v955_v22 }
  0xf0   :  { %v177_v43 = vpop.f32.mrb[3].mxu0  ;;  %v237_v44 = vpop.f32.mrb[3].mxu1 }
  0xf1   :  { %v355_v48 = vrot.slane %v177_v43, 1  ;;  %v361_v49 = vrot.slane %v237_v44, 1  ;;  %v944_v43 = vld [vmem:[#allocation2 + $0xe8] sm:$0xff]  ;;  %1319 = vmatpush3.bf16.msra.mxu0 %v1318_v34 }
  0xf2   :  { %1320 = vmatprep.subr.bf16.mxu0 %v1485_v26 }
  0xf3   :  { %v366_v56 = vsel %vm365_vm2, %v347_v47, %v355_v48  ;;  %v374_v57 = vsel %vm365_vm2, %v355_v48, %v347_v47  ;;  %v372_v58 = vsel %vm365_vm2, %v353_v39, %v361_v49  ;;  %v380_v59 = vsel %vm365_vm2, %v361_v49, %v353_v39  ;;  %v957_v48 = vld [vmem:[#allocation2 + $0x150] sm:$0xff]  ;;  %v958_v49 = vld [vmem:[#allocation2 + $0x158] sm:$0xff] }
  0xf4   :  { %v1591_v62 = vadd.f32 %v366_v56, %v171_v29  ;;  %v1593_v63 = vadd.f32 %v374_v57, %v175_v40  ;;  %v1595_v0 = vadd.f32 %v372_v58, %v231_v30  ;;  %v1597_v1 = vadd.f32 %v380_v59, %v235_v41  ;;  %v942_v29 = vld [vmem:[#allocation2 + $0xd8] sm:$0xff]  ;;  %v927_v59 = vld [vmem:[#allocation2 + $0x60] sm:$0xff] }
  0xf5   :  { %v181_v5 = vpop.f32.mrb[4].mxu0  ;;  %v241_v6 = vpop.f32.mrb[4].mxu1  ;;  %v1293_v35 = vpack.c.bf16 %v942_v29, %v941_v24  ;;  %v1297_v58 = vpack.c.bf16 %v944_v43, %v943_v42  ;;  %v1321_v4 = vpack.c.bf16 %v958_v49, %v957_v48  ;;  %v1299_v16 = vpack.c.bf16 %v928_v60, %v927_v59  ;;  %v962_v29 = vld [vmem:[#allocation2 + $0x178] sm:$0xff] }
  0xf6   :  { %v183_v12 = vpop.f32.mrb[5].mxu0  ;;  %v243_v13 = vpop.f32.mrb[5].mxu1 }
  0xf7   :  { %v354_v18 = vrot.slane %v243_v13, 1  ;;  %v185_v19 = vpop.f32.mrb[6].mxu0  ;;  %v245_v20 = vpop.f32.mrb[6].mxu1  ;;  %v348_v30 = vrot.slane %v183_v12, 1  ;;  %1294 = vmatprep.subr.bf16.mxu1 %v1293_v35  ;;  %v1324_v12 = vpack.c.bf16 %v1616_v54, %v1614_v53  ;;  %1322 = vmatpush3.bf16.msra.mxu0 %v1321_v4 }
  0xf8   :  { %v187_v27 = vpop.f32.mrb[7].mxu0  ;;  %v247_v28 = vpop.f32.mrb[7].mxu1  ;;  %1296 = vmatpush3.bf16.msra.mxu1 %v1295_v52  ;;  %1323 = vmatprep.subr.bf16.mxu0 %v1485_v26 }
  0xf9   :  { %v356_v31 = vrot.slane %v187_v27, 1  ;;  %v362_v32 = vrot.slane %v247_v28, 1  ;;  %1298 = vmatprep.subr.bf16.mxu1 %v1297_v58  ;;  %v961_v28 = vld [vmem:[#allocation2 + $0x170] sm:$0xff] }
  0xfa   :  { %v1327_v43 = vpack.c.bf16 %v962_v29, %v961_v28 }
  0xfb   :  { %v367_v38 = vsel %vm365_vm2, %v348_v30, %v356_v31  ;;  %v375_v39 = vsel %vm365_vm2, %v356_v31, %v348_v30  ;;  %v373_v40 = vsel %vm365_vm2, %v354_v18, %v362_v32  ;;  %v381_v41 = vsel %vm365_vm2, %v362_v32, %v354_v18  ;;  %1325 = vmatpush3.bf16.msra.mxu0 %v1324_v12 }
  0xfc   :  { %v384_v44 = vadd.f32 %v367_v38, %v181_v5  ;;  %v385_v45 = vadd.f32 %v375_v39, %v185_v19  ;;  %v1609_v46 = vadd.f32 %v373_v40, %v241_v6  ;;  %v1611_v47 = vadd.f32 %v381_v41, %v245_v20  ;;  %v946_v5 = vld [vmem:[#allocation2 + $0xf8] sm:$0xff]  ;;  %v1618_v6 = vld [vmem:[#allocation2 + $0x70] sm:$0xff]  ;;  %v1632_v19 = vld [vmem:[%s2041_s2] ss:$0 sm:$0xff]  ;;  %1300 = vmatpush3.bf16.msra.mxu1 %v1299_v16 }
  0xfd   :  { %v191_v50 = vpop.f32.mrb[8].mxu0  ;;  %v1224_v51 = vpop.f32.mrb[8].mxu1  ;;  %v1301_v20 = vpack.c.bf16 %v946_v5, %v945_v61  ;;  %v1303_v21 = vpack.c.bf16 %v1620_v7, %v1618_v6  ;;  %1326 = vmatprep.subr.bf16.mxu0 %v1485_v26 }
  0xfe   :  { %v399_v55 = vrot.slane %v1224_v51, 2  ;;  %v193_v56 = vpop.f32.mrb[9].mxu0  ;;  %v284_v57 = vpop.f32.mrb[9].mxu1 }
  0xff   :  { %v195_v2 = vpop.f32.mrb[10].mxu0  ;;  %v1225_v3 = vpop.f32.mrb[10].mxu1  ;;  %v398_v8 = vrot.slane %v284_v57, 2  ;;  %v349_v13 = vrot.slane %v193_v56, 1  ;;  %1302 = vmatprep.subr.bf16.mxu1 %v1301_v20  ;;  %1328 = vmatpush3.bf16.msra.mxu0 %v1327_v43 }
 0x100   :  { %v407_v9 = vrot.slane %v1225_v3, 2  ;;  %v197_v10 = vpop.f32.mrb[11].mxu0  ;;  %v287_v11 = vpop.f32.mrb[11].mxu1  ;;  %1304 = vmatpush3.bf16.msra.mxu1 %v1303_v21 }
 0x101   :  { %v357_v14 = vrot.slane %v197_v10, 1  ;;  %v406_v15 = vrot.slane %v287_v11, 2 }
 0x102   :  { %v416_v17 = vsel %vm414_vm3, %v399_v55, %v407_v9  ;;  %v424_v18 = vsel %vm414_vm3, %v407_v9, %v399_v55 }
 0x103   :  { %v433_v22 = vadd.f32 %v416_v17, %v384_v44  ;;  %v434_v23 = vadd.f32 %v424_v18, %v385_v45  ;;  %v368_v24 = vsel %vm365_vm2, %v349_v13, %v357_v14  ;;  %v376_v27 = vsel %vm365_vm2, %v357_v14, %v349_v13 }
 0x104   :  { %v1640_v30 = vadd.f32 %v368_v24, %v191_v50  ;;  %v1642_v31 = vadd.f32 %v376_v27, %v195_v2  ;;  %v415_v32 = vsel %vm414_vm3, %v398_v8, %v406_v15  ;;  %v423_v33 = vsel %vm414_vm3, %v406_v15, %v398_v8 }
 0x105   :  { %v456_v34 = vadd.f32 %v1632_v19, %v433_v22  ;;  %v457_v35 = vadd.f32 %v1632_v19, %v434_v23  ;;  %v431_v36 = vadd.f32 %v415_v32, %v1591_v62  ;;  %v432_v37 = vadd.f32 %v423_v33, %v1593_v63  ;;  %v1653_v38 = vpop.f32.mrb[12].mxu0  ;;  %v1655_v39 = vpop.f32.mrb[12].mxu1 }
 0x106   :  { %v401_v40 = vrot.slane %v1655_v39, 2  ;;  %v1658_v41 = vpop.f32.mrb[13].mxu0  ;;  %v1660_v42 = vpop.f32.mrb[13].mxu1  ;;  %v1487_v50 = vmov 0.0  }
 0x107   :  { %v478_v44 = vsel %vm470_vm4, %v456_v34, -inf  ;;  %v543_v45 = vsel %vm535_vm5, %v456_v34, -inf  ;;  %v619_v62 = vsel %vm608_vm6, %v456_v34, -inf  ;;  %v620_v63 = vsel %vm610_vm7, %v457_v35, -inf  ;;  %v1666_v48 = vpop.f32.mrb[14].mxu0  ;;  %v1668_v49 = vpop.f32.mrb[14].mxu1  ;;  %1270 = vmatprep.mubr.msk.f32.mxu0 %vm1486_vm10, %v1487_v50 }
 0x108   :  { %v479_v51 = vrot.slane %v478_v44, 4  ;;  %v544_v52 = vrot.slane %v543_v45, 4  ;;  %v621_v53 = vmax.f32 %v619_v62, %v620_v63  ;;  %v706_v54 = vsel %vm698_vm8, %v457_v35, -inf  ;;  %v1671_v55 = vpop.f32.mrb[15].mxu0  ;;  %v1673_v56 = vpop.f32.mrb[15].mxu1 }
 0x109   :  { %v707_v57 = vrot.slane %v706_v54, 4  ;;  %v779_v58 = vsel %vm771_vm9, %v457_v35, -inf  ;;  %v454_v59 = vadd.f32 %v1632_v19, %v431_v36  ;;  %v1679_v60 = vadd.f32 %v1632_v19, %v432_v37 }
 0x10a   :  { %v480_v61 = vmax.f32 %v478_v44, %v479_v51  ;;  %v545_v2 = vmax.f32 %v543_v45, %v544_v52  ;;  %v622_v3 = vrot.slane %v621_v53, 4  ;;  %v780_v4 = vrot.slane %v779_v58, 4 }
 0x10b   :  { %v708_v5 = vmax.f32 %v706_v54, %v707_v57  ;;  %v471_v6 = vsel %vm470_vm4, %v454_v59, -inf  ;;  %v536_v7 = vsel %vm535_vm5, %v454_v59, -inf  ;;  %v609_v26 = vsel %vm608_vm6, %v454_v59, -inf }
 0x10c   :  { %v481_v8 = vrot.slane %v480_v61, 2  ;;  %v546_v9 = vrot.slane %v545_v2, 2  ;;  %v623_v10 = vmax.f32 %v621_v53, %v622_v3  ;;  %v781_v11 = vmax.f32 %v779_v58, %v780_v4 }
 0x10d   :  { %v709_v12 = vrot.slane %v708_v5, 2  ;;  %v472_v13 = vrot.slane %v471_v6, 4  ;;  %v537_v14 = vrot.slane %v536_v7, 4  ;;  %v611_v15 = vsel %vm610_vm7, %v1679_v60, -inf  ;;  %v1686_v16 = vpop.f32.mrb[16].mxu0  ;;  %v1688_v17 = vpop.f32.mrb[16].mxu1 }
 0x10e   :  { %v482_v18 = vmax.f32 %v480_v61, %v481_v8  ;;  %v547_v20 = vmax.f32 %v545_v2, %v546_v9  ;;  %v624_v21 = vrot.slane %v623_v10, 2  ;;  %v782_v22 = vrot.slane %v781_v11, 2  ;;  %v1690_v23 = vpop.f32.mrb[17].mxu0  ;;  %v1692_v24 = vpop.f32.mrb[17].mxu1 }
 0x10f   :  { %v710_v27 = vmax.f32 %v708_v5, %v709_v12  ;;  %v473_v28 = vmax.f32 %v471_v6, %v472_v13  ;;  %v538_v29 = vmax.f32 %v536_v7, %v537_v14  ;;  %v612_v32 = vmax.f32 %v609_v26, %v611_v15  ;;  %v1694_v33 = vpop.f32.mrb[18].mxu0  ;;  %v1696_v34 = vpop.f32.mrb[18].mxu1 }
 0x110   :  { %v483_v35 = vrot.slane %v482_v18, 1  ;;  %v548_v36 = vrot.slane %v547_v20, 1  ;;  %v625_v37 = vmax.f32 %v623_v10, %v624_v21  ;;  %v783_v43 = vmax.f32 %v781_v11, %v782_v22  ;;  %v1698_v44 = vpop.f32.mrb[19].mxu0  ;;  %v1700_v45 = vpop.f32.mrb[19].mxu1 }
 0x111   :  { %v711_v62 = vrot.slane %v710_v27, 1  ;;  %v474_v63 = vrot.slane %v473_v28, 2  ;;  %v539_v50 = vrot.slane %v538_v29, 2  ;;  %v613_v51 = vrot.slane %v612_v32, 4 }
 0x112   :  { %v484_v52 = vmax.f32 %v482_v18, %v483_v35  ;;  %v549_v53 = vmax.f32 %v547_v20, %v548_v36  ;;  %v626_v54 = vrot.slane %v625_v37, 1  ;;  %v784_v57 = vrot.slane %v783_v43, 1 }
 0x113   :  { %v712_v58 = vmax.f32 %v710_v27, %v711_v62  ;;  %v475_v59 = vmax.f32 %v473_v28, %v474_v63  ;;  %v540_v61 = vmax.f32 %v538_v29, %v539_v50  ;;  %v614_v2 = vmax.f32 %v612_v32, %v613_v51 }
 0x114   :  { %1351 = vtanh.f32 %v484_v52  ;;  %v627_v3 = vmax.f32 %v625_v37, %v626_v54  ;;  %v785_v4 = vmax.f32 %v783_v43, %v784_v57  ;;  %v699_v5 = vsel %vm698_vm8, %v1679_v60, -inf }
 0x115   :  { %1353 = vtanh.f32 %v549_v53  ;;  %v476_v6 = vrot.slane %v475_v59, 1  ;;  %v541_v7 = vrot.slane %v540_v61, 1  ;;  %v615_v26 = vrot.slane %v614_v2, 2  ;;  %v1704_v8 = vpop.f32.mrb[20].mxu0  ;;  %v1706_v9 = vpop.f32.mrb[20].mxu1 }
 0x116   :  { %1355 = vtanh.f32 %v627_v3  ;;  %v700_v10 = vrot.slane %v699_v5, 4  ;;  %v772_v11 = vsel %vm771_vm9, %v1679_v60, -inf  ;;  %v350_v12 = vrot.slane %v1658_v41, 1  ;;  %v1711_v13 = vpop.f32.mrb[21].mxu0  ;;  %v1713_v14 = vpop.f32.mrb[21].mxu1 }
 0x117   :  { %1357 = vtanh.f32 %v712_v58  ;;  %v477_v15 = vmax.f32 %v475_v59, %v476_v6  ;;  %v542_v18 = vmax.f32 %v540_v61, %v541_v7  ;;  %v616_v20 = vmax.f32 %v614_v2, %v615_v26  ;;  %v1715_v21 = vpop.f32.mrb[22].mxu0  ;;  %v1717_v22 = vpop.f32.mrb[22].mxu1 }
 0x118   :  { %1359 = vtanh.f32 %v785_v4  ;;  %v701_v27 = vmax.f32 %v699_v5, %v700_v10  ;;  %v773_v28 = vrot.slane %v772_v11, 4  ;;  %v400_v29 = vrot.slane %v1660_v42, 2  ;;  %v1720_v60 = vpop.f32.mrb[23].mxu0  ;;  %v1722_v41 = vpop.f32.mrb[23].mxu1 }
 0x119   :  { %1361 = vtanh.f32 %v477_v15  ;;  %v617_v32 = vrot.slane %v616_v20, 1  ;;  %v409_v35 = vrot.slane %v1668_v49, 2  ;;  %v358_v36 = vrot.slane %v1671_v55, 1 }
 0x11a   :  { %1363 = vtanh.f32 %v542_v18  ;;  %v702_v37 = vrot.slane %v701_v27, 2  ;;  %v774_v43 = vmax.f32 %v772_v11, %v773_v28  ;;  %v408_v62 = vrot.slane %v1673_v56, 2 }
 0x11b   :  { %v618_v63 = vmax.f32 %v616_v20, %v617_v32  ;;  %v418_v42 = vsel %vm414_vm3, %v401_v40, %v409_v35  ;;  %v426_v50 = vsel %vm414_vm3, %v409_v35, %v401_v40  ;;  %v369_v49 = vsel %vm365_vm2, %v350_v12, %v358_v36 }
 0x11c   :  { %v703_v55 = vmax.f32 %v701_v27, %v702_v37  ;;  %v775_v51 = vrot.slane %v774_v43, 2  ;;  %v377_v52 = vsel %vm365_vm2, %v358_v36, %v350_v12  ;;  %v388_v56 = vadd.f32 %v369_v49, %v1653_v38 }
 0x11d   :  { %1365 = vtanh.f32 %v618_v63  ;;  %v389_v53 = vadd.f32 %v377_v52, %v1666_v48  ;;  %v417_v54 = vsel %vm414_vm3, %v400_v29, %v408_v62  ;;  %v425_v39 = vsel %vm414_vm3, %v408_v62, %v400_v29 }
 0x11e   :  { %v1745_v40 = vpop.eup %1351  ;;  %v704_v57 = vrot.slane %v703_v55, 1  ;;  %v776_v58 = vmax.f32 %v774_v43, %v775_v51  ;;  %v437_v59 = vadd.f32 %v418_v42, %v388_v56  ;;  %v435_v61 = vadd.f32 %v417_v54, %v1640_v30 }
 0x11f   :  { %v1748_v2 = vpop.eup %1353  ;;  %v438_v3 = vadd.f32 %v426_v50, %v389_v53  ;;  %v436_v38 = vadd.f32 %v425_v39, %v1642_v31  ;;  %v411_v15 = vrot.slane %v1696_v34, 2 }
 0x120   :  { %v1753_v5 = vpop.eup %1355  ;;  %v705_v6 = vmax.f32 %v703_v55, %v704_v57  ;;  %v777_v7 = vrot.slane %v776_v58, 1  ;;  %v460_v26 = vadd.f32 %v1632_v19, %v437_v59  ;;  %v458_v10 = vadd.f32 %v1632_v19, %v435_v61 }
 0x121   :  { %v1757_v11 = vpop.eup %1357  ;;  %v461_v30 = vadd.f32 %v1632_v19, %v438_v3  ;;  %v1761_v12 = vadd.f32 %v1632_v19, %v436_v38 }
 0x122   :  { %v1765_v18 = vpop.eup %1359  ;;  %1367 = vtanh.f32 %v705_v6  ;;  %v778_v20 = vmax.f32 %v776_v58, %v777_v7  ;;  %v492_v27 = vsel %vm470_vm4, %v460_v26, -inf  ;;  %v557_v28 = vsel %vm535_vm5, %v460_v26, -inf }
 0x123   :  { %v1769_v29 = vpop.eup %1361  ;;  %v493_v32 = vrot.slane %v492_v27, 4  ;;  %v558_v35 = vrot.slane %v557_v28, 4  ;;  %v637_v36 = vsel %vm608_vm6, %v460_v26, -inf  ;;  %v638_v37 = vsel %vm610_vm7, %v461_v30, -inf }
 0x124   :  { %v1773_v43 = vpop.eup %1363  ;;  %1369 = vtanh.f32 %v778_v20  ;;  %v639_v62 = vmax.f32 %v637_v36, %v638_v37  ;;  %v720_v63 = vsel %vm698_vm8, %v461_v30, -inf  ;;  %v793_v42 = vsel %vm771_vm9, %v461_v30, -inf }
 0x125   :  { %v494_v50 = vmax.f32 %v492_v27, %v493_v32  ;;  %v559_v49 = vmax.f32 %v557_v28, %v558_v35  ;;  %v721_v55 = vrot.slane %v720_v63, 4  ;;  %v794_v51 = vrot.slane %v793_v42, 4 }
 0x126   :  { %v640_v52 = vrot.slane %v639_v62, 4  ;;  %v485_v56 = vsel %vm470_vm4, %v458_v10, -inf  ;;  %v550_v53 = vsel %vm535_vm5, %v458_v10, -inf  ;;  %v628_v54 = vsel %vm608_vm6, %v458_v10, -inf }
 0x127   :  { %v1780_v39 = vpop.eup %1365  ;;  %v495_v57 = vrot.slane %v494_v50, 2  ;;  %v560_v58 = vrot.slane %v559_v49, 2  ;;  %v722_v59 = vmax.f32 %v720_v63, %v721_v55  ;;  %v795_v61 = vmax.f32 %v793_v42, %v794_v51 }
 0x128   :  { %v641_v3 = vmax.f32 %v639_v62, %v640_v52  ;;  %v486_v38 = vrot.slane %v485_v56, 4  ;;  %v551_v6 = vrot.slane %v550_v53, 4  ;;  %v629_v7 = vsel %vm610_vm7, %v1761_v12, -inf }
 0x129   :  { %v496_v26 = vmax.f32 %v494_v50, %v495_v57  ;;  %v561_v30 = vmax.f32 %v559_v49, %v560_v58  ;;  %v723_v20 = vrot.slane %v722_v59, 2  ;;  %v796_v27 = vrot.slane %v795_v61, 2 }
 0x12a   :  { %v642_v28 = vrot.slane %v641_v3, 2  ;;  %v487_v32 = vmax.f32 %v485_v56, %v486_v38  ;;  %v552_v35 = vmax.f32 %v550_v53, %v551_v6  ;;  %v630_v10 = vmax.f32 %v628_v54, %v629_v7 }
 0x12b   :  { %v497_v36 = vrot.slane %v496_v26, 1  ;;  %v562_v37 = vrot.slane %v561_v30, 1  ;;  %v724_v31 = vmax.f32 %v722_v59, %v723_v20  ;;  %v797_v4 = vmax.f32 %v795_v61, %v796_v27 }
 0x12c   :  { %v1784_v63 = vpop.eup %1367  ;;  %v643_v62 = vmax.f32 %v641_v3, %v642_v28  ;;  %v488_v42 = vrot.slane %v487_v32, 2  ;;  %v553_v55 = vrot.slane %v552_v35, 2  ;;  %v631_v51 = vrot.slane %v630_v10, 4 }
 0x12d   :  { %v498_v52 = vmax.f32 %v496_v26, %v497_v36  ;;  %v563_v48 = vmax.f32 %v561_v30, %v562_v37  ;;  %v725_v50 = vrot.slane %v724_v31, 1  ;;  %v798_v49 = vrot.slane %v797_v4, 1 }
 0x12e   :  { %v1786_v57 = vpop.eup %1369  ;;  %v644_v58 = vrot.slane %v643_v62, 1  ;;  %v489_v56 = vmax.f32 %v487_v32, %v488_v42  ;;  %v554_v53 = vmax.f32 %v552_v35, %v553_v55  ;;  %v632_v54 = vmax.f32 %v630_v10, %v631_v51 }
 0x12f   :  { %1371 = vtanh.f32 %v498_v52  ;;  %v726_v38 = vmax.f32 %v724_v31, %v725_v50  ;;  %v799_v59 = vmax.f32 %v797_v4, %v798_v49  ;;  %v713_v61 = vsel %vm698_vm8, %v1761_v12, -inf }
 0x130   :  { %1373 = vtanh.f32 %v563_v48  ;;  %v645_v3 = vmax.f32 %v643_v62, %v644_v58  ;;  %v490_v6 = vrot.slane %v489_v56, 1  ;;  %v555_v7 = vrot.slane %v554_v53, 1 }
 0x131   :  { %1375 = vtanh.f32 %v726_v38  ;;  %v633_v26 = vrot.slane %v632_v54, 2  ;;  %v714_v30 = vrot.slane %v713_v61, 4  ;;  %v786_v20 = vsel %vm771_vm9, %v1761_v12, -inf }
 0x132   :  { %1377 = vtanh.f32 %v645_v3  ;;  %v491_v27 = vmax.f32 %v489_v56, %v490_v6  ;;  %v556_v28 = vmax.f32 %v554_v53, %v555_v7  ;;  %v787_v32 = vrot.slane %v786_v20, 4 }
 0x133   :  { %1379 = vtanh.f32 %v799_v59  ;;  %v634_v31 = vmax.f32 %v632_v54, %v633_v26  ;;  %v715_v4 = vmax.f32 %v713_v61, %v714_v30  ;;  %v2045_v48 = vrot.slane %v1688_v17, 2 }
 0x134   :  { %1381 = vtanh.f32 %v491_v27  ;;  %v788_v10 = vmax.f32 %v786_v20, %v787_v32  ;;  %v359_v37 = vrot.slane %v1698_v44, 1  ;;  %v410_v55 = vrot.slane %v1700_v45, 2 }
 0x135   :  { %v1798_v35 = vsel %vm414_vm3, %v2045_v48, %v411_v15  ;;  %v2046_v36 = vmov %v2045_v48  ;;  %1383 = vtanh.f32 %v556_v28  ;;  %v635_v62 = vrot.slane %v634_v31, 1 }
 0x136   :  { %v1806_v12 = vsel %vm414_vm3, %v411_v15, %v2046_v36  ;;  %v716_v42 = vrot.slane %v715_v4, 2  ;;  %v789_v51 = vrot.slane %v788_v10, 2  ;;  %v2047_v52 = vrot.slane %v1690_v23, 1 }
 0x137   :  { %v405_v15 = vrot.slane %v1706_v9, 2  ;;  %v636_v49 = vmax.f32 %v634_v31, %v635_v62  ;;  %v2049_v53 = vrot.slane %v1692_v24, 2  ;;  %v352_v59 = vrot.slane %v1711_v13, 1 }
 0x138   :  { %v370_v50 = vsel %vm365_vm2, %v2047_v52, %v359_v37  ;;  %v2048_v17 = vmov %v2047_v52  ;;  %v717_v44 = vmax.f32 %v715_v4, %v716_v42  ;;  %v790_v45 = vmax.f32 %v788_v10, %v789_v51 }
 0x139   :  { %v378_v34 = vsel %vm365_vm2, %v359_v37, %v2048_v17  ;;  %v390_v58 = vadd.f32 %v370_v50, %v1686_v16  ;;  %v419_v54 = vsel %vm414_vm3, %v2049_v53, %v410_v55  ;;  %v2050_v38 = vmov %v2049_v53  ;;  %v1830_v9 = vpop.eup %1371 }
 0x13a   :  { %v391_v56 = vadd.f32 %v378_v34, %v1694_v33  ;;  %v427_v23 = vsel %vm414_vm3, %v410_v55, %v2050_v38  ;;  %1385 = vtanh.f32 %v636_v49  ;;  %v718_v61 = vrot.slane %v717_v44, 1  ;;  %v1832_v33 = vpop.eup %1373 }
 0x13b   :  { %v439_v16 = vadd.f32 %v419_v54, %v390_v58  ;;  %v791_v6 = vrot.slane %v790_v45, 1  ;;  %v404_v7 = vrot.slane %v1713_v14, 2  ;;  %v413_v26 = vrot.slane %v1717_v22, 2  ;;  %v1837_v30 = vpop.eup %1375 }
 0x13c   :  { %v440_v3 = vadd.f32 %v427_v23, %v391_v56  ;;  %v360_v24 = vrot.slane %v1720_v60, 1  ;;  %v719_v20 = vmax.f32 %v717_v44, %v718_v61  ;;  %v412_v28 = vrot.slane %v1722_v41, 2  ;;  %v1842_v32 = vpop.eup %1377 }
 0x13d   :  { %v462_v13 = vadd.f32 %v1632_v19, %v439_v16  ;;  %v792_v31 = vmax.f32 %v790_v45, %v791_v6  ;;  %v422_v4 = vsel %vm414_vm3, %v405_v15, %v413_v26  ;;  %v430_v22 = vsel %vm414_vm3, %v413_v26, %v405_v15  ;;  %v1852_v48 = vpop.eup %1379 }
 0x13e   :  { %v463_v27 = vadd.f32 %v1632_v19, %v440_v3  ;;  %v1850_v60 = vsel %vm365_vm2, %v352_v59, %v360_v24  ;;  %1387 = vtanh.f32 %v719_v20  ;;  %v1857_v62 = vpop.eup %1381  ;;  %v445_v15 = vadd.f32 %v422_v4, %v1609_v46 }
 0x13f   :  { %v499_v10 = vsel %vm470_vm4, %v462_v13, -inf  ;;  %v564_v36 = vsel %vm535_vm5, %v462_v13, -inf  ;;  %v646_v37 = vsel %vm608_vm6, %v462_v13, -inf  ;;  %1389 = vtanh.f32 %v792_v31  ;;  %v1860_v52 = vpop.eup %1383 }
 0x140   :  { %v500_v42 = vrot.slane %v499_v10, 4  ;;  %v565_v55 = vrot.slane %v564_v36, 4  ;;  %v647_v51 = vsel %vm610_vm7, %v463_v27, -inf  ;;  %v727_v17 = vsel %vm698_vm8, %v463_v27, -inf }
 0x141   :  { %v648_v50 = vmax.f32 %v646_v37, %v647_v51  ;;  %v800_v34 = vsel %vm771_vm9, %v463_v27, -inf  ;;  %v728_v58 = vrot.slane %v727_v17, 4  ;;  %v446_v53 = vadd.f32 %v430_v22, %v1611_v47 }
 0x142   :  { %v501_v49 = vmax.f32 %v499_v10, %v500_v42  ;;  %v566_v44 = vmax.f32 %v564_v36, %v565_v55  ;;  %v801_v56 = vrot.slane %v800_v34, 4  ;;  %v468_v54 = vadd.f32 %v1632_v19, %v445_v15 }
 0x143   :  { %v649_v45 = vrot.slane %v648_v50, 4  ;;  %v379_v38 = vsel %vm365_vm2, %v360_v24, %v352_v59  ;;  %v729_v16 = vmax.f32 %v727_v17, %v728_v58  ;;  %v469_v46 = vadd.f32 %v1632_v19, %v446_v53 }
 0x144   :  { %v502_v23 = vrot.slane %v501_v49, 2  ;;  %v567_v61 = vrot.slane %v566_v44, 2  ;;  %v802_v3 = vmax.f32 %v800_v34, %v801_v56  ;;  %v1869_v6 = vpop.eup %1385  ;;  %v520_v20 = vsel %vm470_vm4, %v468_v54, -inf }
 0x145   :  { %v650_v26 = vmax.f32 %v648_v50, %v649_v45  ;;  %v585_v13 = vsel %vm535_vm5, %v468_v54, -inf  ;;  %v730_v31 = vrot.slane %v729_v16, 2  ;;  %v521_v10 = vrot.slane %v520_v20, 4 }
 0x146   :  { %v503_v27 = vmax.f32 %v501_v49, %v502_v23  ;;  %v568_v47 = vmax.f32 %v566_v44, %v567_v61  ;;  %v803_v4 = vrot.slane %v802_v3, 2  ;;  %v586_v59 = vrot.slane %v585_v13, 4 }
 0x147   :  { %v651_v22 = vrot.slane %v650_v26, 2  ;;  %v673_v24 = vsel %vm608_vm6, %v468_v54, -inf  ;;  %v731_v42 = vmax.f32 %v729_v16, %v730_v31  ;;  %v522_v17 = vmax.f32 %v520_v20, %v521_v10 }
 0x148   :  { %v504_v36 = vrot.slane %v503_v27, 1  ;;  %v569_v37 = vrot.slane %v568_v47, 1  ;;  %v804_v55 = vmax.f32 %v802_v3, %v803_v4  ;;  %v1875_v51 = vpop.eup %1387  ;;  %v587_v34 = vmax.f32 %v585_v13, %v586_v59 }
 0x149   :  { %v652_v50 = vmax.f32 %v650_v26, %v651_v22  ;;  %v674_v15 = vsel %vm610_vm7, %v469_v46, -inf  ;;  %v1878_v49 = vpop.eup %1389  ;;  %v732_v56 = vrot.slane %v731_v42, 1  ;;  %v523_v23 = vrot.slane %v522_v17, 2 }
 0x14a   :  { %v505_v44 = vmax.f32 %v503_v27, %v504_v36  ;;  %v570_v58 = vmax.f32 %v568_v47, %v569_v37  ;;  %v805_v45 = vrot.slane %v804_v55, 1  ;;  %v588_v54 = vrot.slane %v587_v34, 2 }
 0x14b   :  { %v653_v53 = vrot.slane %v652_v50, 1  ;;  %v675_v61 = vmax.f32 %v673_v24, %v674_v15  ;;  %v733_v16 = vmax.f32 %v731_v42, %v732_v56  ;;  %v748_v31 = vsel %vm698_vm8, %v469_v46, -inf }
 0x14c   :  { %1391 = vtanh.f32 %v505_v44  ;;  %v806_v3 = vmax.f32 %v804_v55, %v805_v45  ;;  %v524_v20 = vmax.f32 %v522_v17, %v523_v23  ;;  %v589_v13 = vmax.f32 %v587_v34, %v588_v54 }
 0x14d   :  { %1393 = vtanh.f32 %v570_v58  ;;  %v654_v26 = vmax.f32 %v652_v50, %v653_v53  ;;  %v676_v4 = vrot.slane %v675_v61, 4  ;;  %v749_v22 = vrot.slane %v748_v31, 4 }
 0x14e   :  { %1395 = vtanh.f32 %v733_v16  ;;  %v821_v27 = vsel %vm771_vm9, %v469_v46, -inf  ;;  %v525_v47 = vrot.slane %v524_v20, 1  ;;  %v590_v10 = vrot.slane %v589_v13, 1 }
 0x14f   :  { %1397 = vtanh.f32 %v654_v26  ;;  %v822_v59 = vrot.slane %v821_v27, 4  ;;  %v677_v24 = vmax.f32 %v675_v61, %v676_v4  ;;  %v750_v36 = vmax.f32 %v748_v31, %v749_v22 }
 0x150   :  { %1399 = vtanh.f32 %v806_v3  ;;  %v392_v37 = vadd.f32 %v1850_v60, %v1704_v8  ;;  %v526_v42 = vmax.f32 %v524_v20, %v525_v47  ;;  %v591_v55 = vmax.f32 %v589_v13, %v590_v10 }
 0x151   :  { %v823_v50 = vmax.f32 %v821_v27, %v822_v59  ;;  %v393_v17 = vadd.f32 %v379_v38, %v1715_v21  ;;  %v678_v34 = vrot.slane %v677_v24, 2  ;;  %v751_v15 = vrot.slane %v750_v36, 2 }
 0x152   :  { %v441_v44 = vadd.f32 %v1798_v35, %v392_v37  ;;  %v421_v46 = vsel %vm414_vm3, %v404_v7, %v412_v28  ;;  %1401 = vtanh.f32 %v591_v55  ;;  %v429_v21 = vsel %vm414_vm3, %v412_v28, %v404_v7 }
 0x153   :  { %v824_v58 = vrot.slane %v823_v50, 2  ;;  %v442_v8 = vadd.f32 %v1806_v12, %v393_v17  ;;  %v679_v60 = vmax.f32 %v677_v24, %v678_v34  ;;  %v752_v35 = vmax.f32 %v750_v36, %v751_v15 }
 0x154   :  { %v464_v38 = vadd.f32 %v1632_v19, %v441_v44  ;;  %v443_v56 = vadd.f32 %v421_v46, %v1595_v0  ;;  %v444_v23 = vadd.f32 %v429_v21, %v1597_v1  ;;  %1403 = vtanh.f32 %v526_v42 }
 0x155   :  { %v825_v45 = vmax.f32 %v823_v50, %v824_v58  ;;  %v465_v53 = vadd.f32 %v1632_v19, %v442_v8  ;;  %v680_v14 = vrot.slane %v679_v60, 1  ;;  %v753_v54 = vrot.slane %v752_v35, 1 }
 0x156   :  { %v1903_v12 = vpop.eup %1391  ;;  %v506_v41 = vsel %vm470_vm4, %v464_v38, -inf  ;;  %v571_v25 = vsel %vm535_vm5, %v464_v38, -inf  ;;  %v655_v0 = vsel %vm608_vm6, %v464_v38, -inf  ;;  %v466_v36 = vadd.f32 %v1632_v19, %v443_v56 }
 0x157   :  { %v1907_v7 = vpop.eup %1393  ;;  %v826_v28 = vrot.slane %v825_v45, 1  ;;  %v507_v61 = vrot.slane %v506_v41, 4  ;;  %v572_v16 = vrot.slane %v571_v25, 4  ;;  %v681_v31 = vmax.f32 %v679_v60, %v680_v14 }
 0x158   :  { %v1910_v3 = vpop.eup %1395  ;;  %v754_v1 = vmax.f32 %v752_v35, %v753_v54  ;;  %v656_v26 = vsel %vm610_vm7, %v465_v53, -inf  ;;  %v734_v20 = vsel %vm698_vm8, %v465_v53, -inf  ;;  %v807_v24 = vsel %vm771_vm9, %v465_v53, -inf }
 0x159   :  { %v1914_v13 = vpop.eup %1397  ;;  %v827_v4 = vmax.f32 %v825_v45, %v826_v28  ;;  %v508_v22 = vmax.f32 %v506_v41, %v507_v61  ;;  %v573_v27 = vmax.f32 %v571_v25, %v572_v16  ;;  %v657_v47 = vmax.f32 %v655_v0, %v656_v26 }
 0x15a   :  { %v1916_v10 = vpop.eup %1399  ;;  %1405 = vtanh.f32 %v681_v31  ;;  %v735_v59 = vrot.slane %v734_v20, 4  ;;  %v808_v17 = vrot.slane %v807_v24, 4  ;;  %v467_v34 = vadd.f32 %v1632_v19, %v444_v23 }
 0x15b   :  { %1407 = vtanh.f32 %v754_v1  ;;  %v509_v37 = vrot.slane %v508_v22, 2  ;;  %v574_v42 = vrot.slane %v573_v27, 2  ;;  %v658_v55 = vrot.slane %v657_v47, 4 }
 0x15c   :  { %1409 = vtanh.f32 %v827_v4  ;;  %v736_v50 = vmax.f32 %v734_v20, %v735_v59  ;;  %v1921_v15 = vpop.eup %1401  ;;  %v513_v8 = vsel %vm470_vm4, %v466_v36, -inf  ;;  %v809_v60 = vmax.f32 %v807_v24, %v808_v17 }
 0x15d   :  { %v510_v44 = vmax.f32 %v508_v22, %v509_v37  ;;  %v575_v46 = vmax.f32 %v573_v27, %v574_v42  ;;  %v659_v58 = vmax.f32 %v657_v47, %v658_v55  ;;  %v514_v35 = vrot.slane %v513_v8, 4 }
 0x15e   :  { %v737_v21 = vrot.slane %v736_v50, 2  ;;  %v578_v38 = vsel %vm535_vm5, %v466_v36, -inf  ;;  %v1925_v56 = vpop.eup %1403  ;;  %v810_v19 = vrot.slane %v809_v60, 2  ;;  %v664_v25 = vsel %vm608_vm6, %v466_v36, -inf }
 0x15f   :  { %v511_v45 = vrot.slane %v510_v44, 1  ;;  %v576_v53 = vrot.slane %v575_v46, 1  ;;  %v660_v14 = vrot.slane %v659_v58, 2  ;;  %v579_v54 = vrot.slane %v578_v38, 4 }
 0x160   :  { %v738_v41 = vmax.f32 %v736_v50, %v737_v21  ;;  %v515_v23 = vmax.f32 %v513_v8, %v514_v35  ;;  %v811_v1 = vmax.f32 %v809_v60, %v810_v19  ;;  %v665_v20 = vsel %vm610_vm7, %v467_v34, -inf }
 0x161   :  { %v512_v28 = vmax.f32 %v510_v44, %v511_v45  ;;  %v577_v61 = vmax.f32 %v575_v46, %v576_v53  ;;  %v661_v16 = vmax.f32 %v659_v58, %v660_v14  ;;  %v580_v0 = vmax.f32 %v578_v38, %v579_v54 }
 0x162   :  { %v739_v31 = vrot.slane %v738_v41, 1  ;;  %v516_v26 = vrot.slane %v515_v23, 2  ;;  %v666_v27 = vmax.f32 %v664_v25, %v665_v20  ;;  %v812_v24 = vrot.slane %v811_v1, 1 }
 0x163   :  { %1411 = vtanh.f32 %v512_v28  ;;  %v662_v4 = vrot.slane %v661_v16, 1  ;;  %v581_v22 = vrot.slane %v580_v0, 2  ;;  %v741_v17 = vsel %vm698_vm8, %v467_v34, -inf }
 0x164   :  { %v1406_v47 = vpop.eup %1405  ;;  %1413 = vtanh.f32 %v577_v61  ;;  %v740_v59 = vmax.f32 %v738_v41, %v739_v31  ;;  %v517_v37 = vmax.f32 %v515_v23, %v516_v26  ;;  %v667_v50 = vrot.slane %v666_v27, 4 }
 0x165   :  { %v1408_v42 = vpop.eup %1407  ;;  %v663_v36 = vmax.f32 %v661_v16, %v662_v4  ;;  %v582_v55 = vmax.f32 %v580_v0, %v581_v22  ;;  %v813_v46 = vmax.f32 %v811_v1, %v812_v24  ;;  %v742_v8 = vrot.slane %v741_v17, 4 }
 0x166   :  { %v1930_v44 = vpop.eup %1409  ;;  %1415 = vtanh.f32 %v740_v59  ;;  %v518_v58 = vrot.slane %v517_v37, 1  ;;  %v668_v60 = vmax.f32 %v666_v27, %v667_v50  ;;  %v814_v35 = vsel %vm771_vm9, %v467_v34, -inf }
 0x167   :  { %1417 = vtanh.f32 %v663_v36  ;;  %v583_v21 = vrot.slane %v582_v55, 1  ;;  %v743_v45 = vmax.f32 %v741_v17, %v742_v8  ;;  %v815_v53 = vrot.slane %v814_v35, 4 }
 0x168   :  { %1419 = vtanh.f32 %v813_v46  ;;  %v519_v38 = vmax.f32 %v517_v37, %v518_v58  ;;  %v669_v54 = vrot.slane %v668_v60, 2  ;;  %v1935_v41 = vadd.f32 %v1773_v43, %v1769_v29 }
 0x169   :  { %v584_v14 = vmax.f32 %v582_v55, %v583_v21  ;;  %v1939_v19 = vadd.f32 %v1748_v2, %v1745_v40  ;;  %v744_v23 = vrot.slane %v743_v45, 2  ;;  %v816_v25 = vmax.f32 %v814_v35, %v815_v53 }
 0x16a   :  { %1421 = vtanh.f32 %v519_v38  ;;  %v1943_v34 = vadd.f32 %v1860_v52, %v1857_v62  ;;  %v670_v28 = vmax.f32 %v668_v60, %v669_v54  ;;  %v1947_v61 = vadd.f32 %v1832_v33, %v1830_v9 }
 0x16b   :  { %1423 = vtanh.f32 %v584_v14  ;;  %v1951_v43 = vadd.f32 %v1907_v7, %v1903_v12  ;;  %v745_v16 = vmax.f32 %v743_v45, %v744_v23  ;;  %v817_v2 = vrot.slane %v816_v25, 2 }
 0x16c   :  { %v1955_v0 = vadd.f32 %v1925_v56, %v1921_v15  ;;  %v690_v52 = vadd.f32 %v1780_v39, %v1935_v41  ;;  %v671_v1 = vrot.slane %v670_v28, 1  ;;  %v691_v33 = vadd.f32 %v1753_v5, %v1939_v19 }
 0x16d   :  { %v1959_v31 = vpop.eup %1411  ;;  %v692_v7 = vadd.f32 %v1869_v6, %v1943_v34  ;;  %v693_v26 = vadd.f32 %v1842_v32, %v1947_v61  ;;  %v746_v15 = vrot.slane %v745_v16, 1  ;;  %v818_v4 = vmax.f32 %v816_v25, %v817_v2 }
 0x16e   :  { %v1414_v20 = vpop.eup %1413  ;;  %v694_v39 = vadd.f32 %v1914_v13, %v1951_v43  ;;  %v1970_v22 = vadd.f32 %v1406_v47, %v1955_v0  ;;  %v672_v27 = vmax.f32 %v670_v28, %v671_v1  ;;  %v763_v6 = vadd.f32 %v1784_v63, %v690_v52 }
 0x16f   :  { %v1973_v5 = vadd.f32 %v1414_v20, %v1959_v31  ;;  %v764_v59 = vadd.f32 %v1757_v11, %v691_v33  ;;  %v747_v24 = vmax.f32 %v745_v16, %v746_v15  ;;  %v819_v37 = vrot.slane %v818_v4, 1 }
 0x170   :  { %v1416_v32 = vpop.eup %1415  ;;  %v765_v36 = vadd.f32 %v1875_v51, %v692_v7  ;;  %v766_v13 = vadd.f32 %v1837_v30, %v693_v26  ;;  %1425 = vtanh.f32 %v672_v27  ;;  %v767_v55 = vadd.f32 %v1910_v3, %v694_v39 }
 0x171   :  { %v1418_v47 = vpop.eup %1417  ;;  %v770_v50 = vadd.f32 %v1408_v42, %v1970_v22  ;;  %v836_v17 = vadd.f32 %v1786_v57, %v763_v6  ;;  %1427 = vtanh.f32 %v747_v24  ;;  %v820_v11 = vmax.f32 %v818_v4, %v819_v37 }
 0x172   :  { %v1420_v63 = vpop.eup %1419  ;;  %v695_v46 = vadd.f32 %v1418_v47, %v1973_v5  ;;  %v837_v58 = vadd.f32 %v1765_v18, %v764_v59  ;;  %v838_v51 = vadd.f32 %v1878_v49, %v765_v36  ;;  %v839_v30 = vadd.f32 %v1852_v48, %v766_v13 }
 0x173   :  { %v840_v8 = vadd.f32 %v1916_v10, %v767_v55  ;;  %v843_v21 = vadd.f32 %v1930_v44, %v770_v50  ;;  %1429 = vtanh.f32 %v820_v11  ;;  %v844_v57 = vsub.f32 %v763_v6, %v1769_v29 }
 0x174   :  { %v1422_v3 = vpop.eup %1421  ;;  %v768_v42 = vadd.f32 %v1416_v32, %v695_v46  ;;  %v845_v60 = vsub.f32 %v764_v59, %v1745_v40  ;;  %v846_v38 = vsub.f32 %v765_v36, %v1857_v62  ;;  %v847_v18 = vsub.f32 %v766_v13, %v1830_v9 }
 0x175   :  { %v1424_v35 = vpop.eup %1423  ;;  %v848_v49 = vsub.f32 %v767_v55, %v1903_v12  ;;  %v851_v48 = vsub.f32 %v770_v50, %v1925_v56  ;;  %v869_v29 = vsel %vm868_vm11, %v691_v33, %v690_v52  ;;  %v852_v40 = vsub.f32 %v836_v17, %v1935_v41  ;;  %v1158_v50 = vld [vmem:[%s2043_s4] ss:$0 sm:$0xff] }
 0x176   :  { %v606_v45 = vadd.f32 %v1424_v35, %v1422_v3  ;;  %v841_v10 = vadd.f32 %v1420_v63, %v768_v42  ;;  %v849_v44 = vsub.f32 %v768_v42, %v1959_v31  ;;  %v891_v53 = vsel %vm868_vm11, %v845_v60, %v844_v57 }
 0x177   :  { %v892_v14 = vsel %vm870_vm12, %v846_v38, %v891_v53  ;;  %v853_v62 = vsub.f32 %v837_v58, %v1939_v19  ;;  %v871_v12 = vsel %vm870_vm12, %v692_v7, %v869_v29  ;;  %v854_v56 = vsub.f32 %v838_v51, %v1943_v34 }
 0x178   :  { %v893_v9 = vsel %vm872_vm13, %v847_v18, %v892_v14  ;;  %v855_v54 = vsub.f32 %v839_v30, %v1947_v61  ;;  %v873_v25 = vsel %vm872_vm13, %v693_v26, %v871_v12  ;;  %v856_v28 = vsub.f32 %v840_v8, %v1951_v43 }
 0x179   :  { %v894_v23 = vsel %vm874_vm14, %v848_v49, %v893_v9  ;;  %v857_v16 = vsub.f32 %v841_v10, %v1973_v5  ;;  %v875_v19 = vsel %vm874_vm14, %v694_v39, %v873_v25  ;;  %v859_v2 = vsub.f32 %v843_v21, %v1955_v0 }
 0x17a   :  { %v895_v41 = vsel %vm876_vm15, %v849_v44, %v894_v23  ;;  %v907_v52 = vsel %vm868_vm11, %v853_v62, %v852_v40  ;;  %v1426_v31 = vpop.eup %1425  ;;  %v877_v34 = vsel %vm876_vm15, %v695_v46, %v875_v19 }
 0x17b   :  { %v908_v61 = vsel %vm870_vm12, %v854_v56, %v907_v52  ;;  %v1428_v1 = vpop.eup %1427  ;;  %v696_v33 = vadd.f32 %v1426_v31, %v606_v45 }
 0x17c   :  { %v909_v43 = vsel %vm872_vm13, %v855_v54, %v908_v61 }
 0x17d   :  { %v910_v7 = vsel %vm874_vm14, %v856_v28, %v909_v43  ;;  %v1430_v26 = vpop.eup %1429  ;;  %v769_v20 = vadd.f32 %v1428_v1, %v696_v33  ;;  %v879_v15 = vsel %vm878_vm0, %v696_v33, %v877_v34 }
 0x17e   :  { %v911_v0 = vsel %vm876_vm15, %v857_v16, %v910_v7  ;;  %v881_v4 = vsel %vm880_vm1, %v1970_v22, %v879_v15 }
 0x17f   :  { %v842_v39 = vadd.f32 %v1430_v26, %v769_v20  ;;  %v850_v27 = vsub.f32 %v769_v20, %v1422_v3 }
 0x181   :  { %v896_v5 = vsel %vm878_vm0, %v850_v27, %v895_v41  ;;  %v858_v6 = vsub.f32 %v842_v39, %v606_v45 }
 0x182   :  { %v897_v59 = vsel %vm880_vm1, %v851_v48, %v896_v5 }
 0x183   :  { %1027 = vmatprep.mubr.f32.mxu1 %v897_v59  ;;  %v912_v32 = vsel %vm878_vm0, %v858_v6, %v911_v0 }
 0x184   :  { %1028 = vmatmul.mubr.f32.vlgmr.msra.gmra.mrb[24].mxu1 %v881_v4  ;;  %v913_v24 = vsel %vm880_vm1, %v859_v2, %v912_v32 }
 0x185   :  { %1271 = vmatmul.mubr.f32.vlgmr.msra.gmra.mrb[24].mxu0 %v913_v24 }
 0x257   :  { %v1200_v37 = vpop.f32.mrb[24].mxu1 }
 0x258   :  { %v1201_v36 = vpop.f32.mrb[25].mxu1  ;;  %v1099_v13 = vpop.f32.mrb[24].mxu0 }
 0x259   :  { %v1202_v47 = vadd.f32 %v1201_v36, %v1200_v37  ;;  %v1272_v55 = vpop.f32.mrb[25].mxu0 }
 0x25b   :  { %v1100_v22 = vadd.f32 %v1202_v47, %v1099_v13 }
 0x25d   :  { %v1103_v17 = vmul.f32 0.33333334, %v1100_v22 }
 0x25f   :  { %v1111_v63 = vadd.f32 %v1158_v50, %v1103_v17 }
 0x261   :  { %1431 = vtanh.f32 %v1111_v63 }
 0x26b   :  { %v1432_v11 = vpop.eup %1431 }
 0x26c   :  { %1113 = vst [vmem:[#allocation5] sm:$0xff] %v1432_v11 }
 0x26d   :  { %1466 = shalt.err (!%p1463_p12)
}
 0x26e   :  { %s1467_s7 = scalar_lea.hbm %s2044_s5, 128 }
 0x26f   :  { %p1468_p13 = scmp.ne.s32.totalorder %s2044_s5, %s1467_s7  ;;  %p1471_p0 = scmp.lt.u32.totalorder %s1467_s7, %s2044_s5 }
 0x271   :  { %p1473_p1 = pnand %p1471_p0, %p1468_p13 }
 0x273   :  { %1476 = shalt.err (!%p1473_p1)
}
 0x274   :  { %1123 = dma.vmem_to_hbm [thread:$0]  %s1121_s28, 128, %s2044_s5, [#allocation4]  }
 0x275   :  { %1479 = dma.done.wait [#allocation4], 128  }
 0x276   :  { %1480 = vsyncadd [#allocation4], 4294967168 }
 0x277   :  { %1127 = vsyncpa [#allocation3], 1 }
 0x278   :  { %1128 = vsyncpa [#allocation4], 1 }

</bundles_post_ra>
